<compile_context>
chip_gen: v7x
topology: tpu7x:2x2x1
jax: 0.10.0
libtpu: 0.0.40
codegen_flags: <defaults>
</compile_context>

<pallas_src>
import math

import jax
import jax.numpy as jnp
from jax.experimental import pallas as pl
from jax.experimental.pallas import tpu as pltpu


# ----------------------------------------------------------------------------
# Kernels
# ----------------------------------------------------------------------------
def _dstate_kernel(x_ref, w1_ref, b1_ref, w2_ref, b2_ref, o_ref):
    """Drift net over one tile of flattened rows.

    x_ref : (TM, H+1)  rows are [state, t]  (time folded in as the last column)
    w1    : (H+1, MLP) = vstack([w1h, w1t]);  w2 : (MLP, H)
    """
    z = jnp.dot(x_ref[...], w1_ref[...],
                preferred_element_type=jnp.float32) + b1_ref[...]
    a = jnp.tanh(z)
    o = jnp.dot(a, w2_ref[...], preferred_element_type=jnp.float32) + b2_ref[...]
    o_ref[...] = o.astype(o_ref.dtype)


def _gru_nocond_kernel(h_ref, wh_ref, b_ref, o_ref):
    """GRU jump, zero-width cond: input-side gates collapse to their biases.

    wh_ref : (3, H, H) stacked [wh_r, wh_z, wh_n]
    b_ref  : (4, H)    rows    [bi_r+bh_r, bi_z+bh_z, bi_n, bh_n]
    """
    h = h_ref[...]
    b = b_ref[...]
    ghr = jnp.dot(h, wh_ref[0], preferred_element_type=jnp.float32)
    ghz = jnp.dot(h, wh_ref[1], preferred_element_type=jnp.float32)
    ghn = jnp.dot(h, wh_ref[2], preferred_element_type=jnp.float32)
    r = jax.nn.sigmoid(ghr + b[0:1])
    z = jax.nn.sigmoid(ghz + b[1:2])
    n = jnp.tanh(b[2:3] + r * (ghn + b[3:4]))          # r gates gh_n only
    o_ref[...] = ((1.0 - z) * n + z * h).astype(o_ref.dtype)


def _gru_cond_kernel(x_ref, h_ref, wi_ref, wh_ref, b_ref, o_ref):
    """GRU jump with a real cond input (per-gate weights, no lane slicing).

    wi_ref : (3, C, H),  wh_ref : (3, H, H),  b_ref : (4, H) as above.
    """
    x = x_ref[...]
    h = h_ref[...]
    b = b_ref[...]
    gir = jnp.dot(x, wi_ref[0], preferred_element_type=jnp.float32)
    giz = jnp.dot(x, wi_ref[1], preferred_element_type=jnp.float32)
    gin = jnp.dot(x, wi_ref[2], preferred_element_type=jnp.float32)
    ghr = jnp.dot(h, wh_ref[0], preferred_element_type=jnp.float32)
    ghz = jnp.dot(h, wh_ref[1], preferred_element_type=jnp.float32)
    ghn = jnp.dot(h, wh_ref[2], preferred_element_type=jnp.float32)
    r = jax.nn.sigmoid(gir + ghr + b[0:1])
    z = jax.nn.sigmoid(giz + ghz + b[1:2])
    n = jnp.tanh(gin + b[2:3] + r * (ghn + b[3:4]))    # r gates gh_n only
    o_ref[...] = ((1.0 - z) * n + z * h).astype(o_ref.dtype)


# ----------------------------------------------------------------------------
# Wrappers
# ----------------------------------------------------------------------------
_VMEM = pl.BlockSpec(memory_space=pltpu.MemorySpace.VMEM)   # whole array in VMEM


def _choose_row_tile(rows, max_tile):
    """Largest useful row tile.

    * rows <= max_tile : one full-extent block, except when there is enough
      work (>=512 rows) to split into 2 even steps so "parallel" can engage
      both v7x TensorCores (harmless on v5e/v6e).
    * rows  > max_tile : prefer an exact divisor (no ragged tail); otherwise
      max_tile with a clipped last tile.
    """
    if rows <= max_tile:
        half = rows // 2
        if rows >= 512 and half % 8 == 0:
            return half
        return rows
    for tm in range(max_tile, max_tile // 2, -8):
        if rows % tm == 0:
            return tm
    return max_tile


def dstate_forward_batched(ts, states, p, max_row_tile=1024):
    """Fused drift: evaluate dstate_net at N (t_i, state_i) pairs in ONE call.

    ts:     (N,)        float32 times
    states: (N, B, H)   float32 states
    returns (N, B, H)   d(state)/dt
    """
    N, B, H = states.shape
    rows = N * B
    # Fold the time column into the input: x = [state, t]  -> (rows, H+1).
    x = jnp.concatenate(
        [states.reshape(rows, H).astype(jnp.float32),
         jnp.repeat(ts.astype(jnp.float32), B)[:, None]], axis=1)

    tm = _choose_row_tile(rows, max_row_tile)
    grid = (pl.cdiv(rows, tm),)

    row_in_spec = pl.BlockSpec((tm, H + 1), lambda i: (i, 0))
    row_out_spec = pl.BlockSpec((tm, H), lambda i: (i, 0))
    # Weights: same (0, 0) block every grid step -> VMEM-resident, no re-DMA.
    w_spec = lambda arr: pl.BlockSpec(arr.shape, lambda i: (0, 0))

    out = pl.pallas_call(
        _dstate_kernel,
        out_shape=jax.ShapeDtypeStruct((rows, H), jnp.float32),
        grid=grid,
        in_specs=[row_in_spec,
                  w_spec(p["w1"]), w_spec(p["b1"]),
                  w_spec(p["w2"]), w_spec(p["b2"])],
        out_specs=row_out_spec,
        compiler_params=pltpu.CompilerParams(
            dimension_semantics=("parallel",)),
    )(x, p["w1"], p["b1"], p["w2"], p["b2"])

    return out.reshape(N, B, H)


def dstate_forward(t, tpp_state, p):
    """GRUHiddenStateODEFunc.forward(t, tpp_state) — single evaluation."""
    ts = jnp.asarray(t, jnp.float32).reshape(1)
    return dstate_forward_batched(ts, tpp_state[None], p)[0]


def gru_update_state(t, tpp_state, p, cond=None):
    """GRUHiddenStateODEFunc.update_state(t, tpp_state, cond)."""
    del t  # unused by update_net, matching the PyTorch module
    bsz, hidden = tpp_state.shape
    out_shape = jax.ShapeDtypeStruct((bsz, hidden), jnp.float32)

    if cond is None:
        # torch builds zeros(bsz, 0): the input-side matmul contributes
        # nothing, so gi = bi directly (no zero matrix, no dead matmul).
        return pl.pallas_call(
            _gru_nocond_kernel,
            out_shape=out_shape,
            in_specs=[_VMEM] * 3,
            out_specs=_VMEM,
        )(tpp_state.astype(jnp.float32), p["gru_wh"], p["gru_b"])

    return pl.pallas_call(
        _gru_cond_kernel,
        out_shape=out_shape,
        in_specs=[_VMEM] * 5,
        out_specs=_VMEM,
    )(cond.astype(jnp.float32), tpp_state.astype(jnp.float32),
      p["gru_wi"], p["gru_wh"], p["gru_b"])


# ----------------------------------------------------------------------------
# Deterministic parameter construction (PyTorch-style uniform fan-in init)
# ----------------------------------------------------------------------------
def init_params(key, hidden, mlp, cond_dim):
    ks = jax.random.split(key, 17)
    u = lambda k, shape, bound: jax.random.uniform(
        k, shape, jnp.float32, -bound, bound)
    b1_in = 1.0 / math.sqrt(hidden + 1)      # Linear(hidden+1, mlp)
    b2_in = 1.0 / math.sqrt(mlp)             # Linear(mlp, hidden)
    bg = 1.0 / math.sqrt(hidden)             # GRUCell init bound
    return {
        # dstate_net
        "w1h": u(ks[0], (hidden, mlp), b1_in),
        "w1t": u(ks[1], (1, mlp), b1_in),
        "b1":  u(ks[2], (1, mlp), b1_in),
        "w2":  u(ks[3], (mlp, hidden), b2_in),
        "b2":  u(ks[4], (1, hidden), b2_in),
        # update_net (GRUCell), gate order [r, z, n]
        "wi_r": u(ks[5], (cond_dim, hidden), bg),
        "wi_z": u(ks[6], (cond_dim, hidden), bg),
        "wi_n": u(ks[7], (cond_dim, hidden), bg),
        "wh_r": u(ks[8], (hidden, hidden), bg),
        "wh_z": u(ks[9], (hidden, hidden), bg),
        "wh_n": u(ks[10], (hidden, hidden), bg),
        "bi_r": u(ks[11], (1, hidden), bg),
        "bi_z": u(ks[12], (1, hidden), bg),
        "bi_n": u(ks[13], (1, hidden), bg),
        "bh_r": u(ks[14], (1, hidden), bg),
        "bh_z": u(ks[15], (1, hidden), bg),
        "bh_n": u(ks[16], (1, hidden), bg),
    }


def pack_params(p):
    """One-time packing of per-gate params into the kernel operand layout."""
    return {
        "w1": jnp.concatenate([p["w1h"], p["w1t"]], axis=0),        # (H+1, MLP)
        "b1": p["b1"],
        "w2": p["w2"],
        "b2": p["b2"],
        "gru_wi": jnp.stack([p["wi_r"], p["wi_z"], p["wi_n"]]),     # (3, C, H)
        "gru_wh": jnp.stack([p["wh_r"], p["wh_z"], p["wh_n"]]),     # (3, H, H)
        "gru_b": jnp.concatenate(
            [p["bi_r"] + p["bh_r"], p["bi_z"] + p["bh_z"],
             p["bi_n"], p["bh_n"]], axis=0),                        # (4, H)
    }


# ----------------------------------------------------------------------------
# Pure-JAX references for verification (operate on the raw per-gate params)
# ----------------------------------------------------------------------------
def ref_dstate(t, h, p):
    z = h @ p["w1h"] + t * p["w1t"] + p["b1"]
    return jnp.tanh(z) @ p["w2"] + p["b2"]


def ref_gru(cond, h, p):
    gi_r = cond @ p["wi_r"] + p["bi_r"]
    gi_z = cond @ p["wi_z"] + p["bi_z"]
    gi_n = cond @ p["wi_n"] + p["bi_n"]
    gh_r = h @ p["wh_r"] + p["bh_r"]
    gh_z = h @ p["wh_z"] + p["bh_z"]
    gh_n = h @ p["wh_n"] + p["bh_n"]
    r = jax.nn.sigmoid(gi_r + gh_r)
    z = jax.nn.sigmoid(gi_z + gh_z)
    n = jnp.tanh(gi_n + r * gh_n)
    return (1.0 - z) * n + z * h


# ----------------------------------------------------------------------------
if __name__ == "__main__":
    BSZ, HIDDEN, MLP, COND = 8, 32, 64, 4

    key = jax.random.PRNGKey(0)
    k_params, k_state, k_cond, k_s1, k_s2, k_s3 = jax.random.split(key, 6)
    raw = init_params(k_params, HIDDEN, MLP, COND)
    params = pack_params(raw)

    tpp_state = jax.random.normal(k_state, (BSZ, HIDDEN), jnp.float32)
    cond = jax.random.normal(k_cond, (BSZ, COND), jnp.float32)
    t = jnp.float32(0.5)
    vref = jax.vmap(lambda tt, ss: ref_dstate(tt, ss, raw))

    # Fused drift: single tile (rows = 128).
    N1 = 16
    ts1 = jnp.linspace(0.0, 1.0, N1, dtype=jnp.float32)
    st1 = jax.random.normal(k_s1, (N1, BSZ, HIDDEN), jnp.float32)
    d1 = jax.block_until_ready(dstate_forward_batched(ts1, st1, params))
    assert d1.shape == (N1, BSZ, HIDDEN)
    assert jnp.allclose(d1, vref(ts1, st1), atol=1e-5, rtol=1e-5)

    # Fused drift: two even grid steps (rows = 640 -> both v7x cores usable).
    N2 = 80
    ts2 = jnp.linspace(0.0, 2.0, N2, dtype=jnp.float32)
    st2 = jax.random.normal(k_s2, (N2, BSZ, HIDDEN), jnp.float32)
    d2 = jax.block_until_ready(dstate_forward_batched(ts2, st2, params))
    assert jnp.allclose(d2, vref(ts2, st2), atol=1e-5, rtol=1e-5)

    # Fused drift: ragged last tile (rows = 328, tile = 256, no pad copy).
    N3 = 41
    ts3 = jnp.linspace(-1.0, 1.0, N3, dtype=jnp.float32)
    st3 = jax.random.normal(k_s3, (N3, BSZ, HIDDEN), jnp.float32)
    d3 = jax.block_until_ready(
        dstate_forward_batched(ts3, st3, params, max_row_tile=256))
    assert jnp.allclose(d3, vref(ts3, st3), atol=1e-5, rtol=1e-5)

    # Single-evaluation forward(t, tpp_state) (module parity).
    d_state = jax.block_until_ready(dstate_forward(t, tpp_state, params))
    assert d_state.shape == (BSZ, HIDDEN)
    assert jnp.allclose(d_state, ref_dstate(t, tpp_state, raw),
                        atol=1e-5, rtol=1e-5)

    # update_state(t, tpp_state, cond=None): zero-width cond -> gi = bi.
    new_state = jax.block_until_ready(gru_update_state(t, tpp_state, params, None))
    assert new_state.shape == (BSZ, HIDDEN)
    zero_cond = jnp.zeros((BSZ, COND), jnp.float32)   # reference-only stand-in
    assert jnp.allclose(new_state, ref_gru(zero_cond, tpp_state, raw),
                        atol=1e-5, rtol=1e-5)

    # update_state with a real cond.
    new_state_c = jax.block_until_ready(
        gru_update_state(t, tpp_state, params, cond))
    assert jnp.allclose(new_state_c, ref_gru(cond, tpp_state, raw),
                        atol=1e-5, rtol=1e-5)

    print("KERNEL_OK")
</pallas_src>

<mosaic_0001>
module attributes {stable_mosaic.version = 11 : i64} {
  func.func @_dstate_kernel(%arg0: i32, %arg1: memref<128x33xf32, #tpu.memory_space<vmem>>, %arg2: memref<33x64xf32, #tpu.memory_space<vmem>>, %arg3: memref<1x64xf32, #tpu.memory_space<vmem>>, %arg4: memref<64x32xf32, #tpu.memory_space<vmem>>, %arg5: memref<1x32xf32, #tpu.memory_space<vmem>>, %arg6: memref<128x32xf32, #tpu.memory_space<vmem>>) attributes {dimension_semantics = [#tpu.dimension_semantics<parallel>], iteration_bounds = array<i64: 1>, scalar_prefetch = 0 : i64, scratch_operands = 0 : i64, tpu.core_type = #tpu.core_type<tc>, window_params = [{transform_indices = @transform_0, window_bounds = array<i64: 128, 33>}, {pipeline_mode = #tpu.pipeline_mode<synchronous>, transform_indices = @transform_1, window_bounds = array<i64: 33, 64>}, {pipeline_mode = #tpu.pipeline_mode<synchronous>, transform_indices = @transform_2, window_bounds = array<i64: 1, 64>}, {pipeline_mode = #tpu.pipeline_mode<synchronous>, transform_indices = @transform_3, window_bounds = array<i64: 64, 32>}, {pipeline_mode = #tpu.pipeline_mode<synchronous>, transform_indices = @transform_4, window_bounds = array<i64: 1, 32>}, {transform_indices = @transform_5, window_bounds = array<i64: 128, 32>}]} {
    %c0 = arith.constant 0 : index
    %c0_0 = arith.constant 0 : index
    %0 = vector.load %arg1[%c0, %c0_0] : memref<128x33xf32, #tpu.memory_space<vmem>>, vector<128x33xf32>
    %c0_1 = arith.constant 0 : index
    %c0_2 = arith.constant 0 : index
    %1 = vector.load %arg2[%c0_1, %c0_2] : memref<33x64xf32, #tpu.memory_space<vmem>>, vector<33x64xf32>
    %cst = arith.constant dense<0.000000e+00> : vector<128x64xf32>
    %2 = tpu.matmul %0, %1, %cst {dimension_numbers = #tpu.dot_dimension_numbers<[1], [0], [0], [1], [0, 0, 1, 1], [], []>} : vector<128x33xf32>, vector<33x64xf32>, vector<128x64xf32> -> vector<128x64xf32>
    %c0_3 = arith.constant 0 : index
    %c0_4 = arith.constant 0 : index
    %3 = vector.load %arg3[%c0_3, %c0_4] : memref<1x64xf32, #tpu.memory_space<vmem>>, vector<1x64xf32>
    %4 = vector.broadcast %3 : vector<1x64xf32> to vector<128x64xf32>
    %5 = arith.addf %2, %4 : vector<128x64xf32>
    %6 = math.tanh %5 : vector<128x64xf32>
    %c0_5 = arith.constant 0 : index
    %c0_6 = arith.constant 0 : index
    %7 = vector.load %arg4[%c0_5, %c0_6] : memref<64x32xf32, #tpu.memory_space<vmem>>, vector<64x32xf32>
    %cst_7 = arith.constant dense<0.000000e+00> : vector<128x32xf32>
    %8 = tpu.matmul %6, %7, %cst_7 {dimension_numbers = #tpu.dot_dimension_numbers<[1], [0], [0], [1], [0, 0, 1, 1], [], []>} : vector<128x64xf32>, vector<64x32xf32>, vector<128x32xf32> -> vector<128x32xf32>
    %c0_8 = arith.constant 0 : index
    %c0_9 = arith.constant 0 : index
    %9 = vector.load %arg5[%c0_8, %c0_9] : memref<1x32xf32, #tpu.memory_space<vmem>>, vector<1x32xf32>
    %10 = vector.broadcast %9 : vector<1x32xf32> to vector<128x32xf32>
    %11 = arith.addf %8, %10 : vector<128x32xf32>
    %c0_10 = arith.constant 0 : index
    %c0_11 = arith.constant 0 : index
    %12 = vector.load %arg6[%c0_10, %c0_11] : memref<128x32xf32, #tpu.memory_space<vmem>>, vector<128x32xf32>
    tpu.vector_store %arg6[%c0_10, %c0_11], %11 {strides = array<i32>} : memref<128x32xf32, #tpu.memory_space<vmem>>, vector<128x32xf32>,
    return
  }
  func.func @transform_0(%arg0: i32) -> (i32, i32) {
    %c0_i32 = arith.constant 0 : i32
    %c0_i32_0 = arith.constant 0 : i32
    return %arg0, %c0_i32 : i32, i32
  }
  func.func @transform_1(%arg0: i32) -> (i32, i32) {
    %c0_i32 = arith.constant 0 : i32
    %c0_i32_0 = arith.constant 0 : i32
    %c0_i32_1 = arith.constant 0 : i32
    return %c0_i32, %c0_i32_0 : i32, i32
  }
  func.func @transform_2(%arg0: i32) -> (i32, i32) {
    %c0_i32 = arith.constant 0 : i32
    %c0_i32_0 = arith.constant 0 : i32
    %c0_i32_1 = arith.constant 0 : i32
    return %c0_i32, %c0_i32_0 : i32, i32
  }
  func.func @transform_3(%arg0: i32) -> (i32, i32) {
    %c0_i32 = arith.constant 0 : i32
    %c0_i32_0 = arith.constant 0 : i32
    %c0_i32_1 = arith.constant 0 : i32
    return %c0_i32, %c0_i32_0 : i32, i32
  }
  func.func @transform_4(%arg0: i32) -> (i32, i32) {
    %c0_i32 = arith.constant 0 : i32
    %c0_i32_0 = arith.constant 0 : i32
    %c0_i32_1 = arith.constant 0 : i32
    return %c0_i32, %c0_i32_0 : i32, i32
  }
  func.func @transform_5(%arg0: i32) -> (i32, i32) {
    %c0_i32 = arith.constant 0 : i32
    %c0_i32_0 = arith.constant 0 : i32
    return %arg0, %c0_i32 : i32, i32
  }
}

</mosaic_0001>

<bundles_post_ra>
// kernel: tpu_custom_call.1
= control target key start
LH: loop header
LB: loop body
LE: loop exit
PB: predicated region body
PF: predicated region fallthrough
CT: control target
= control target key end

     0   :  { %vm48_vm0 = vcmask 269312   ;;  %vm97_vm1 = vcmask 1040384   ;;  %vm277_vm2 = vcmask 523264   ;;  %vm471_vm3 = vcmask 261120   ;;  %s939_s1 = inlined_call_operand.vmem [shape: f32[33,64], index: 1, kind: input, shape index: {}]   ;;  %s940_s0 = inlined_call_operand.vmem [shape: f32[128,33], index: 0, kind: input, shape index: {}]   ;;  %s941_s3 = inlined_call_operand.vmem [shape: f32[64,32], index: 3, kind: input, shape index: {}]   ;;  %s942_s2 = inlined_call_operand.vmem [shape: f32[1,64], index: 2, kind: input, shape index: {}]   ;;  %s943_s4 = inlined_call_operand.vmem [shape: f32[1,32], index: 4, kind: input, shape index: {}]   ;;  %s944_s5 = inlined_call_operand.vmem [shape: f32[128,32], index: 5, kind: output, shape index: {}]  }
   0x1   :  { %v36_v0 = vld [vmem:[%s939_s1] sm:$0xff]  ;;  %v37_v1 = vld [vmem:[%s939_s1 + $0x8] sm:$0xff]  ;;  %v38_v2 = vld [vmem:[%s939_s1 + $0x10] sm:$0xff] }
   0x2   :  { %v646_v3 = vpack.c.bf16 %v37_v1, %v36_v0  ;;  %v39_v4 = vld [vmem:[%s939_s1 + $0x18] sm:$0xff]  ;;  %v20_v5 = vld [vmem:[%s940_s0] sm:$0xff]  ;;  %v21_v8 = vld [vmem:[%s940_s0 + $0x8] sm:$0xff] }
   0x3   :  { %v650_v6 = vpack.c.bf16 %v39_v4, %v38_v2  ;;  %582 = vmatprep.mubr.msk.f32.mxu0 %vm48_vm0, %v20_v5  ;;  %v40_v7 = vld [vmem:[%s939_s1 + $0x20] sm:$0x1]  ;;  %v22_v9 = vld [vmem:[%s940_s0 + $0x10] sm:$0xff]  ;;  %v23_v10 = vld [vmem:[%s940_s0 + $0x18] sm:$0xff] }
   0x4   :  { %647 = vmatprep.subr.bf16.mxu0 %v646_v3  ;;  %v24_v11 = vld [vmem:[%s940_s0 + $0x20] sm:$0xff]  ;;  %v25_v12 = vld [vmem:[%s940_s0 + $0x28] sm:$0xff]  ;;  %v26_v13 = vld [vmem:[%s940_s0 + $0x30] sm:$0xff] }
   0x5   :  { %649 = vmatpush3.bf16.msra.mxu0 %v646_v3  ;;  %v27_v14 = vld [vmem:[%s940_s0 + $0x38] sm:$0xff]  ;;  %v28_v15 = vld [vmem:[%s940_s0 + $0x40] sm:$0xff]  ;;  %v29_v16 = vld [vmem:[%s940_s0 + $0x48] sm:$0xff] }
   0x6   :  { %651 = vmatprep.subr.bf16.mxu0 %v650_v6  ;;  %v30_v17 = vld [vmem:[%s940_s0 + $0x50] sm:$0xff]  ;;  %v31_v18 = vld [vmem:[%s940_s0 + $0x58] sm:$0xff]  ;;  %v32_v19 = vld [vmem:[%s940_s0 + $0x60] sm:$0xff] }
   0x7   :  { %v33_v20 = vld [vmem:[%s940_s0 + $0x68] sm:$0xff]  ;;  %v34_v21 = vld [vmem:[%s940_s0 + $0x70] sm:$0xff]  ;;  %v35_v22 = vld [vmem:[%s940_s0 + $0x78] sm:$0xff] }
   0x8   :  { %v262_v23 = vld [vmem:[%s941_s3] sm:$0xff]  ;;  %v263_v24 = vld [vmem:[%s941_s3 + $0x8] sm:$0xff]  ;;  %v264_v26 = vld [vmem:[%s941_s3 + $0x10] sm:$0xff] }
   0x9   :  { %653 = vmatpush3.bf16.msra.mxu0 %v650_v6  ;;  %v654_v25 = vpack.c.bf16 %v263_v24, %v262_v23  ;;  %v265_v27 = vld [vmem:[%s941_s3 + $0x18] sm:$0xff]  ;;  %v266_v29 = vld [vmem:[%s941_s3 + $0x20] sm:$0xff]  ;;  %v267_v30 = vld [vmem:[%s941_s3 + $0x28] sm:$0xff] }
   0xa   :  { %580 = vmatprep.subr.msk.mxu0 %vm97_vm1, %v40_v7  ;;  %v658_v28 = vpack.c.bf16 %v265_v27, %v264_v26  ;;  %v662_v31 = vpack.c.bf16 %v267_v30, %v266_v29  ;;  %v268_v32 = vld [vmem:[%s941_s3 + $0x30] sm:$0xff]  ;;  %v269_v33 = vld [vmem:[%s941_s3 + $0x38] sm:$0xff]  ;;  %v838_v35 = vld [vmem:[%s942_s2] ss:$0 sm:$0xff] }
   0xb   :  { %655 = vmatprep.subr.bf16.mxu1 %v654_v25  ;;  %v666_v34 = vpack.c.bf16 %v269_v33, %v268_v32 }
   0xc   :  { %657 = vmatpush3.bf16.msra.mxu1 %v654_v25 }
   0xd   :  { %581 = vmatpush3.msk.msra.mxu0 %vm97_vm1, %v40_v7  ;;  %659 = vmatprep.subr.bf16.mxu1 %v658_v28 }
   0xe   :  { %583 = vmatmul.mubr.msk.f32.vlgmr.msra.gmra.mrb[0].mxu0 %vm48_vm0, %v21_v8 }
   0xf   :  { %585 = vmatprep.mubr.msk.f32.mxu0 %vm48_vm0, %v22_v9 }
  0x10   :  { %661 = vmatpush3.bf16.msra.mxu1 %v658_v28 }
  0x11   :  { %663 = vmatprep.subr.bf16.mxu1 %v662_v31 }
  0x12   :  { %586 = vmatmul.mubr.msk.f32.gmra.mrb[2].mxu0 %vm48_vm0, %v23_v10 }
  0x13   :  { %588 = vmatprep.mubr.msk.f32.mxu0 %vm48_vm0, %v24_v11 }
  0x14   :  { %665 = vmatpush3.bf16.msra.mxu1 %v662_v31 }
  0x15   :  { %667 = vmatprep.subr.bf16.mxu1 %v666_v34 }
  0x16   :  { %589 = vmatmul.mubr.msk.f32.gmra.mrb[4].mxu0 %vm48_vm0, %v25_v12 }
  0x17   :  { %591 = vmatprep.mubr.msk.f32.mxu0 %vm48_vm0, %v26_v13 }
  0x18   :  { %669 = vmatpush3.bf16.msra.mxu1 %v666_v34 }
  0x1a   :  { %592 = vmatmul.mubr.msk.f32.gmra.mrb[6].mxu0 %vm48_vm0, %v27_v14 }
  0x1b   :  { %594 = vmatprep.mubr.msk.f32.mxu0 %vm48_vm0, %v28_v15 }
  0x1e   :  { %595 = vmatmul.mubr.msk.f32.gmra.mrb[8].mxu0 %vm48_vm0, %v29_v16 }
  0x1f   :  { %597 = vmatprep.mubr.msk.f32.mxu0 %vm48_vm0, %v30_v17 }
  0x22   :  { %598 = vmatmul.mubr.msk.f32.gmra.mrb[10].mxu0 %vm48_vm0, %v31_v18 }
  0x23   :  { %600 = vmatprep.mubr.msk.f32.mxu0 %vm48_vm0, %v32_v19 }
  0x26   :  { %601 = vmatmul.mubr.msk.f32.gmra.mrb[12].mxu0 %vm48_vm0, %v33_v20  ;;  %v510_v20 = vld [vmem:[%s943_s4] ss:$0 sm:$0xff] }
  0x27   :  { %603 = vmatprep.mubr.msk.f32.mxu0 %vm48_vm0, %v34_v21 }
  0x2a   :  { %604 = vmatmul.mubr.msk.f32.gmra.mrb[14].mxu0 %vm48_vm0, %v35_v22 }
  0xe1   :  { %v584_v36 = vpop.f32.mrb[0].mxu0 }
  0xe2   :  { %v173_v37 = vadd.f32 %v584_v36, %v838_v35  ;;  %v167_v38 = vpop.f32.mrb[1].mxu0 }
  0xe3   :  { %v168_v39 = vadd.f32 %v838_v35, %v167_v38 }
  0xe5   :  { %670 = vtanh.f32 %v168_v39  ;;  %v587_v40 = vpop.f32.mrb[2].mxu0 }
  0xe6   :  { %672 = vtanh.f32 %v173_v37  ;;  %v183_v41 = vadd.f32 %v587_v40, %v838_v35  ;;  %v177_v42 = vpop.f32.mrb[3].mxu0 }
  0xe7   :  { %v178_v43 = vadd.f32 %v838_v35, %v177_v42 }
  0xe9   :  { %674 = vtanh.f32 %v178_v43  ;;  %v590_v44 = vpop.f32.mrb[4].mxu0 }
  0xea   :  { %676 = vtanh.f32 %v183_v41  ;;  %v193_v45 = vadd.f32 %v590_v44, %v838_v35  ;;  %v187_v46 = vpop.f32.mrb[5].mxu0 }
  0xeb   :  { %v188_v47 = vadd.f32 %v838_v35, %v187_v46 }
  0xed   :  { %678 = vtanh.f32 %v188_v47  ;;  %v593_v48 = vpop.f32.mrb[6].mxu0 }
  0xee   :  { %680 = vtanh.f32 %v193_v45  ;;  %v203_v49 = vadd.f32 %v593_v48, %v838_v35  ;;  %v197_v50 = vpop.f32.mrb[7].mxu0 }
  0xef   :  { %v671_v51 = vpop.eup %670  ;;  %v198_v52 = vadd.f32 %v838_v35, %v197_v50 }
  0xf0   :  { %v673_v53 = vpop.eup %672  ;;  %622 = vmatprep.mubr.msk.f32.mxu1 %vm277_vm2, %v671_v51 }
  0xf1   :  { %682 = vtanh.f32 %v198_v52  ;;  %v596_v54 = vpop.f32.mrb[8].mxu0  ;;  %623 = vmatmul.mubr.msk.f32.vlgmr.msra.gmra.mrb[0].mxu1 %vm277_vm2, %v673_v53 }
  0xf2   :  { %684 = vtanh.f32 %v203_v49  ;;  %v213_v55 = vadd.f32 %v596_v54, %v838_v35  ;;  %v207_v56 = vpop.f32.mrb[9].mxu0 }
  0xf3   :  { %v675_v57 = vpop.eup %674  ;;  %v208_v58 = vadd.f32 %v838_v35, %v207_v56 }
  0xf4   :  { %v677_v59 = vpop.eup %676  ;;  %625 = vmatprep.mubr.msk.f32.mxu1 %vm277_vm2, %v675_v57 }
  0xf5   :  { %686 = vtanh.f32 %v208_v58  ;;  %v599_v60 = vpop.f32.mrb[10].mxu0  ;;  %626 = vmatmul.mubr.msk.f32.gmra.mrb[2].mxu1 %vm277_vm2, %v677_v59 }
  0xf6   :  { %688 = vtanh.f32 %v213_v55  ;;  %v223_v61 = vadd.f32 %v599_v60, %v838_v35  ;;  %v217_v62 = vpop.f32.mrb[11].mxu0 }
  0xf7   :  { %v679_v63 = vpop.eup %678  ;;  %v218_v0 = vadd.f32 %v838_v35, %v217_v62 }
  0xf8   :  { %v681_v1 = vpop.eup %680  ;;  %628 = vmatprep.mubr.msk.f32.mxu1 %vm277_vm2, %v679_v63 }
  0xf9   :  { %690 = vtanh.f32 %v218_v0  ;;  %v602_v2 = vpop.f32.mrb[12].mxu0  ;;  %629 = vmatmul.mubr.msk.f32.gmra.mrb[4].mxu1 %vm277_vm2, %v681_v1 }
  0xfa   :  { %692 = vtanh.f32 %v223_v61  ;;  %v233_v3 = vadd.f32 %v602_v2, %v838_v35  ;;  %v227_v4 = vpop.f32.mrb[13].mxu0 }
  0xfb   :  { %v683_v5 = vpop.eup %682  ;;  %v228_v6 = vadd.f32 %v838_v35, %v227_v4 }
  0xfc   :  { %v685_v7 = vpop.eup %684  ;;  %631 = vmatprep.mubr.msk.f32.mxu1 %vm277_vm2, %v683_v5 }
  0xfd   :  { %694 = vtanh.f32 %v228_v6  ;;  %v605_v8 = vpop.f32.mrb[14].mxu0  ;;  %632 = vmatmul.mubr.msk.f32.gmra.mrb[6].mxu1 %vm277_vm2, %v685_v7 }
  0xfe   :  { %696 = vtanh.f32 %v233_v3  ;;  %v243_v9 = vadd.f32 %v605_v8, %v838_v35  ;;  %v237_v10 = vpop.f32.mrb[15].mxu0 }
  0xff   :  { %v687_v11 = vpop.eup %686  ;;  %v238_v12 = vadd.f32 %v838_v35, %v237_v10 }
 0x100   :  { %v689_v13 = vpop.eup %688  ;;  %634 = vmatprep.mubr.msk.f32.mxu1 %vm277_vm2, %v687_v11 }
 0x101   :  { %698 = vtanh.f32 %v238_v12  ;;  %635 = vmatmul.mubr.msk.f32.gmra.mrb[8].mxu1 %vm277_vm2, %v689_v13 }
 0x102   :  { %700 = vtanh.f32 %v243_v9 }
 0x103   :  { %v691_v14 = vpop.eup %690 }
 0x104   :  { %v693_v15 = vpop.eup %692  ;;  %637 = vmatprep.mubr.msk.f32.mxu1 %vm277_vm2, %v691_v14 }
 0x105   :  { %638 = vmatmul.mubr.msk.f32.gmra.mrb[10].mxu1 %vm277_vm2, %v693_v15 }
 0x107   :  { %v695_v16 = vpop.eup %694 }
 0x108   :  { %v697_v17 = vpop.eup %696  ;;  %640 = vmatprep.mubr.msk.f32.mxu1 %vm277_vm2, %v695_v16 }
 0x109   :  { %641 = vmatmul.mubr.msk.f32.gmra.mrb[12].mxu1 %vm277_vm2, %v697_v17 }
 0x10b   :  { %v699_v18 = vpop.eup %698 }
 0x10c   :  { %v701_v19 = vpop.eup %700  ;;  %643 = vmatprep.mubr.msk.f32.mxu1 %vm277_vm2, %v699_v18 }
 0x10d   :  { %644 = vmatmul.mubr.msk.f32.gmra.mrb[14].mxu1 %vm277_vm2, %v701_v19 }
 0x1c4   :  { %v624_v21 = vpop.f32.mrb[0].mxu1 }
 0x1c5   :  { %v398_v22 = vadd.f32 %v624_v21, %v510_v20  ;;  %v392_v23 = vpop.f32.mrb[1].mxu1 }
 0x1c6   :  { %v393_v24 = vadd.f32 %v510_v20, %v392_v23 }
 0x1c7   :  { %473 = vst.msk [vmem:[%s944_s5 + $0x8] sm:$0xff] %vm471_vm3, %v398_v22 }
 0x1c8   :  { %472 = vst.msk [vmem:[%s944_s5] sm:$0xff] %vm471_vm3, %v393_v24  ;;  %v627_v25 = vpop.f32.mrb[2].mxu1 }
 0x1c9   :  { %v408_v26 = vadd.f32 %v627_v25, %v510_v20  ;;  %v402_v27 = vpop.f32.mrb[3].mxu1 }
 0x1ca   :  { %v403_v28 = vadd.f32 %v510_v20, %v402_v27 }
 0x1cb   :  { %475 = vst.msk [vmem:[%s944_s5 + $0x18] sm:$0xff] %vm471_vm3, %v408_v26 }
 0x1cc   :  { %474 = vst.msk [vmem:[%s944_s5 + $0x10] sm:$0xff] %vm471_vm3, %v403_v28  ;;  %v630_v29 = vpop.f32.mrb[4].mxu1 }
 0x1cd   :  { %v418_v30 = vadd.f32 %v630_v29, %v510_v20  ;;  %v412_v31 = vpop.f32.mrb[5].mxu1 }
 0x1ce   :  { %v413_v32 = vadd.f32 %v510_v20, %v412_v31 }
 0x1cf   :  { %477 = vst.msk [vmem:[%s944_s5 + $0x28] sm:$0xff] %vm471_vm3, %v418_v30 }
 0x1d0   :  { %476 = vst.msk [vmem:[%s944_s5 + $0x20] sm:$0xff] %vm471_vm3, %v413_v32  ;;  %v633_v33 = vpop.f32.mrb[6].mxu1 }
 0x1d1   :  { %v428_v34 = vadd.f32 %v633_v33, %v510_v20  ;;  %v422_v35 = vpop.f32.mrb[7].mxu1 }
 0x1d2   :  { %v423_v36 = vadd.f32 %v510_v20, %v422_v35 }
 0x1d3   :  { %479 = vst.msk [vmem:[%s944_s5 + $0x38] sm:$0xff] %vm471_vm3, %v428_v34 }
 0x1d4   :  { %478 = vst.msk [vmem:[%s944_s5 + $0x30] sm:$0xff] %vm471_vm3, %v423_v36  ;;  %v636_v37 = vpop.f32.mrb[8].mxu1 }
 0x1d5   :  { %v438_v38 = vadd.f32 %v636_v37, %v510_v20  ;;  %v432_v39 = vpop.f32.mrb[9].mxu1 }
 0x1d6   :  { %v433_v40 = vadd.f32 %v510_v20, %v432_v39 }
 0x1d7   :  { %481 = vst.msk [vmem:[%s944_s5 + $0x48] sm:$0xff] %vm471_vm3, %v438_v38 }
 0x1d8   :  { %480 = vst.msk [vmem:[%s944_s5 + $0x40] sm:$0xff] %vm471_vm3, %v433_v40  ;;  %v639_v41 = vpop.f32.mrb[10].mxu1 }
 0x1d9   :  { %v448_v42 = vadd.f32 %v639_v41, %v510_v20  ;;  %v442_v43 = vpop.f32.mrb[11].mxu1 }
 0x1da   :  { %v443_v44 = vadd.f32 %v510_v20, %v442_v43 }
 0x1db   :  { %483 = vst.msk [vmem:[%s944_s5 + $0x58] sm:$0xff] %vm471_vm3, %v448_v42 }
 0x1dc   :  { %482 = vst.msk [vmem:[%s944_s5 + $0x50] sm:$0xff] %vm471_vm3, %v443_v44  ;;  %v642_v45 = vpop.f32.mrb[12].mxu1 }
 0x1dd   :  { %v458_v46 = vadd.f32 %v642_v45, %v510_v20  ;;  %v452_v47 = vpop.f32.mrb[13].mxu1 }
 0x1de   :  { %v453_v48 = vadd.f32 %v510_v20, %v452_v47 }
 0x1df   :  { %485 = vst.msk [vmem:[%s944_s5 + $0x68] sm:$0xff] %vm471_vm3, %v458_v46 }
 0x1e0   :  { %484 = vst.msk [vmem:[%s944_s5 + $0x60] sm:$0xff] %vm471_vm3, %v453_v48  ;;  %v645_v49 = vpop.f32.mrb[14].mxu1 }
 0x1e1   :  { %v468_v50 = vadd.f32 %v645_v49, %v510_v20  ;;  %v462_v51 = vpop.f32.mrb[15].mxu1 }
 0x1e2   :  { %v463_v52 = vadd.f32 %v510_v20, %v462_v51 }
 0x1e3   :  { %487 = vst.msk [vmem:[%s944_s5 + $0x78] sm:$0xff] %vm471_vm3, %v468_v50 }
 0x1e4   :  { %486 = vst.msk [vmem:[%s944_s5 + $0x70] sm:$0xff] %vm471_vm3, %v463_v52 }

</bundles_post_ra>
